<compile_context>
chip_gen: v5e
topology: v5e:2x2
jax: 0.10.0
libtpu: 0.0.40
codegen_flags: <defaults>
</compile_context>

<pallas_src>
import jax
import jax.numpy as jnp
from jax.experimental import pallas as pl
from jax.experimental.pallas import tpu as pltpu

NUM_DEVICES = 3
STATE_DIM = NUM_DEVICES * 4        # 12
ACTION_DIM = NUM_DEVICES           # 3
IN_DIM = STATE_DIM + ACTION_DIM    # 15
H1, H2, OUT = 128, 64, 1

# Batch tile (lane axis).  With the transposed layout a TB=2048 step needs only
# ~1.7 MiB of VMEM (inputs + h1/h2 temporaries), far inside every chip's budget.
TB_MAX = 2048


def _round_up(x, m):
    return ((x + m - 1) // m) * m


def _choose_tile(B):
    """Pick the batch tile: single full-dim tile (no padding) for small B,
    otherwise a multiple of 128 with >= 2 tiles so both v7x cores get work."""
    if B <= 256:
        return B, B, 1
    tb = min(_round_up(pl.cdiv(B, 2), 128), TB_MAX)
    b_pad = _round_up(B, tb)
    return tb, b_pad, b_pad // tb


def qnet_kernel(x_ref, w1t_ref, b1_ref, w2t_ref, b2_ref, w3_ref, b3_ref, o_ref):
    # x_ref: [15, TB]  -- merged state++action, batch on the lane axis.
    # fc1: [128,15] @ [15,TB] -> [128,TB]   (single MXU matmul, full output width)
    h1 = jnp.dot(w1t_ref[...], x_ref[...], preferred_element_type=jnp.float32)
    h1 = jnp.maximum(h1 + b1_ref[...], 0.0)                       # b1: [128,1]

    # fc2: [64,128] @ [128,TB] -> [64,TB]
    h2 = jnp.dot(w2t_ref[...], h1, preferred_element_type=jnp.float32)
    h2 = jnp.maximum(h2 + b2_ref[...], 0.0)                       # b2: [64,1]

    # fc3 (N=1): VPU multiply + sublane (XLU) reduce instead of an MXU matmul.
    out_row = jnp.sum(h2 * w3_ref[...], axis=0, keepdims=True) + b3_ref[0, 0]
    o_ref[...] = out_row.astype(o_ref.dtype)                      # [1, TB] lane-dense


def pack_params(params):
    """One-time kernel-layout packing (hoisted out of the per-call forward)."""
    w1, b1, w2, b2, w3, b3 = params                # w1:[15,128] b1:[1,128] w2:[128,64]
    return (jnp.asarray(w1.T, jnp.float32),        # [128, 15]
            jnp.asarray(b1, jnp.float32).reshape(H1, 1),
            jnp.asarray(w2.T, jnp.float32),        # [64, 128]
            jnp.asarray(b2, jnp.float32).reshape(H2, 1),
            jnp.asarray(w3, jnp.float32).reshape(H2, 1),
            jnp.asarray(b3, jnp.float32).reshape(1, 1))           # SMEM scalar


@jax.jit
def qnetwork_forward(state, action, packed):
    """state: [B, NUM_DEVICES, 4] (or [B, 12]); action: [B, 3] -> Q values [B, 1]."""
    w1t, b1c, w2t, b2c, w3c, b3s = packed
    state_flat = state.reshape(-1, STATE_DIM)      # torch .view(-1, state_dim)
    B = state_flat.shape[0]

    tb, b_pad, nb = _choose_tile(B)

    # Merged + transposed LHS [15, b_pad] (batch on the lane axis).  The concat,
    # transpose and (optional) tail pad fuse into a single XLA output pass.
    x_t = jnp.concatenate([state_flat, action], axis=1).T          # [15, B]
    if b_pad != B:
        x_t = jnp.pad(x_t, ((0, 0), (0, b_pad - B)))

    cost = pl.CostEstimate(
        flops=2 * b_pad * (IN_DIM * H1 + H1 * H2 + H2),
        transcendentals=0,
        bytes_accessed=(b_pad * IN_DIM * 4 + b_pad * 4
                        + (H1 * IN_DIM + H1 + H2 * H1 + 2 * H2 + 1) * 4))

    out = pl.pallas_call(
        qnet_kernel,
        out_shape=jax.ShapeDtypeStruct((1, b_pad), jnp.float32),
        grid=(nb,),
        in_specs=[
            pl.BlockSpec((IN_DIM, tb), lambda i: (0, i)),       # merged input tile
            pl.BlockSpec((H1, IN_DIM), lambda i: (0, 0)),       # W1^T   (resident)
            pl.BlockSpec((H1, 1), lambda i: (0, 0)),            # b1 column
            pl.BlockSpec((H2, H1), lambda i: (0, 0)),           # W2^T
            pl.BlockSpec((H2, 1), lambda i: (0, 0)),            # b2 column
            pl.BlockSpec((H2, 1), lambda i: (0, 0)),            # w3 column
            pl.BlockSpec(memory_space=pltpu.MemorySpace.SMEM),  # b3 scalar
        ],
        out_specs=pl.BlockSpec((1, tb), lambda i: (0, i)),      # lane-dense output row
        compiler_params=pltpu.CompilerParams(
            dimension_semantics=("parallel",)),
        cost_estimate=cost,
    )(x_t, w1t, b1c, w2t, b2c, w3c, b3s)

    return out[0, :B].reshape(B, OUT)


def init_params(key):
    """Deterministic init mirroring nn.Linear default (uniform +/- 1/sqrt(fan_in))."""
    def linear(key, fan_in, fan_out):
        kw, kb = jax.random.split(key)
        bound = 1.0 / jnp.sqrt(fan_in)
        w = jax.random.uniform(kw, (fan_in, fan_out), jnp.float32, -bound, bound)
        b = jax.random.uniform(kb, (1, fan_out), jnp.float32, -bound, bound)
        return w, b

    k1, k2, k3 = jax.random.split(key, 3)
    w1, b1 = linear(k1, IN_DIM, H1)
    w2, b2 = linear(k2, H1, H2)
    w3, b3 = linear(k3, H2, OUT)
    return (w1, b1, w2, b2, w3, b3)


if __name__ == "__main__":
    key = jax.random.PRNGKey(0)
    kp, ks, ka = jax.random.split(key, 3)

    params = init_params(kp)
    packed = pack_params(params)          # one-time kernel-layout packing

    B = 8
    state = jax.random.normal(ks, (B, NUM_DEVICES, 4), jnp.float32)   # [8, 3, 4]
    action = jax.random.normal(ka, (B, ACTION_DIM), jnp.float32)      # [8, 3]

    q = qnetwork_forward(state, action, packed)
    jax.block_until_ready(q)

    # Pure-JAX f32 reference matching the PyTorch forward.
    w1, b1, w2, b2, w3, b3 = params
    x = jnp.concatenate([state.reshape(-1, STATE_DIM), action], axis=1)
    h1 = jnp.maximum(x @ w1 + b1, 0.0)
    h2 = jnp.maximum(h1 @ w2 + b2, 0.0)
    ref = h2 @ w3 + b3

    assert q.shape == (B, OUT)
    assert jnp.allclose(q, ref, atol=1e-2, rtol=1e-2), "mismatch vs reference"

    print("KERNEL_OK")
</pallas_src>

<mosaic_0001>
module attributes {stable_mosaic.version = 11 : i64} {
  func.func @qnet_kernel(%arg0: i32, %arg1: memref<15x8xf32, #tpu.memory_space<vmem>>, %arg2: memref<128x15xf32, #tpu.memory_space<vmem>>, %arg3: memref<128x1xf32, #tpu.memory_space<vmem>>, %arg4: memref<64x128xf32, #tpu.memory_space<vmem>>, %arg5: memref<64x1xf32, #tpu.memory_space<vmem>>, %arg6: memref<64x1xf32, #tpu.memory_space<vmem>>, %arg7: memref<1x1xf32, #tpu.memory_space<smem>>, %arg8: memref<1x8xf32, #tpu.memory_space<vmem>>) attributes {dimension_semantics = [#tpu.dimension_semantics<parallel>], iteration_bounds = array<i64: 1>, scalar_prefetch = 0 : i64, scratch_operands = 0 : i64, tpu.core_type = #tpu.core_type<tc>, window_params = [{transform_indices = @transform_0, window_bounds = array<i64: 15, 8>}, {pipeline_mode = #tpu.pipeline_mode<synchronous>, transform_indices = @transform_1, window_bounds = array<i64: 128, 15>}, {pipeline_mode = #tpu.pipeline_mode<synchronous>, transform_indices = @transform_2, window_bounds = array<i64: 128, 1>}, {pipeline_mode = #tpu.pipeline_mode<synchronous>, transform_indices = @transform_3, window_bounds = array<i64: 64, 128>}, {pipeline_mode = #tpu.pipeline_mode<synchronous>, transform_indices = @transform_4, window_bounds = array<i64: 64, 1>}, {pipeline_mode = #tpu.pipeline_mode<synchronous>, transform_indices = @transform_5, window_bounds = array<i64: 64, 1>}, {transform_indices = @transform_6, window_bounds = array<i64: 1, 1>}, {transform_indices = @transform_7, window_bounds = array<i64: 1, 8>}]} {
    %c0 = arith.constant 0 : index
    %c0_0 = arith.constant 0 : index
    %0 = vector.load %arg2[%c0, %c0_0] : memref<128x15xf32, #tpu.memory_space<vmem>>, vector<128x15xf32>
    %c0_1 = arith.constant 0 : index
    %c0_2 = arith.constant 0 : index
    %1 = vector.load %arg1[%c0_1, %c0_2] : memref<15x8xf32, #tpu.memory_space<vmem>>, vector<15x8xf32>
    %cst = arith.constant dense<0.000000e+00> : vector<128x8xf32>
    %2 = tpu.matmul %0, %1, %cst {dimension_numbers = #tpu.dot_dimension_numbers<[1], [0], [0], [1], [0, 0, 1, 1], [], []>} : vector<128x15xf32>, vector<15x8xf32>, vector<128x8xf32> -> vector<128x8xf32>
    %c0_3 = arith.constant 0 : index
    %c0_4 = arith.constant 0 : index
    %3 = vector.load %arg3[%c0_3, %c0_4] : memref<128x1xf32, #tpu.memory_space<vmem>>, vector<128x1xf32>
    %4 = vector.broadcast %3 : vector<128x1xf32> to vector<128x8xf32>
    %5 = arith.addf %2, %4 : vector<128x8xf32>
    %cst_5 = arith.constant 0.000000e+00 : f32
    %6 = vector.broadcast %cst_5 : f32 to vector<128x8xf32>
    %7 = arith.maximumf %5, %6 : vector<128x8xf32>
    %c0_6 = arith.constant 0 : index
    %c0_7 = arith.constant 0 : index
    %8 = vector.load %arg4[%c0_6, %c0_7] : memref<64x128xf32, #tpu.memory_space<vmem>>, vector<64x128xf32>
    %cst_8 = arith.constant dense<0.000000e+00> : vector<64x8xf32>
    %9 = tpu.matmul %8, %7, %cst_8 {dimension_numbers = #tpu.dot_dimension_numbers<[1], [0], [0], [1], [0, 0, 1, 1], [], []>} : vector<64x128xf32>, vector<128x8xf32>, vector<64x8xf32> -> vector<64x8xf32>
    %c0_9 = arith.constant 0 : index
    %c0_10 = arith.constant 0 : index
    %10 = vector.load %arg5[%c0_9, %c0_10] : memref<64x1xf32, #tpu.memory_space<vmem>>, vector<64x1xf32>
    %11 = vector.broadcast %10 : vector<64x1xf32> to vector<64x8xf32>
    %12 = arith.addf %9, %11 : vector<64x8xf32>
    %cst_11 = arith.constant 0.000000e+00 : f32
    %13 = vector.broadcast %cst_11 : f32 to vector<64x8xf32>
    %14 = arith.maximumf %12, %13 : vector<64x8xf32>
    %c0_12 = arith.constant 0 : index
    %c0_13 = arith.constant 0 : index
    %15 = vector.load %arg6[%c0_12, %c0_13] : memref<64x1xf32, #tpu.memory_space<vmem>>, vector<64x1xf32>
    %16 = vector.broadcast %15 : vector<64x1xf32> to vector<64x8xf32>
    %17 = arith.mulf %14, %16 : vector<64x8xf32>
    %cst_14 = arith.constant dense<0.000000e+00> : vector<8xf32>
    %18 = vector.multi_reduction <add>, %17, %cst_14 [0] : vector<64x8xf32> to vector<8xf32>
    %19 = vector.shape_cast %18 : vector<8xf32> to vector<1x8xf32>
    %c0_15 = arith.constant 0 : index
    %c0_16 = arith.constant 0 : index
    %20 = memref.load %arg7[%c0_15, %c0_16] : memref<1x1xf32, #tpu.memory_space<smem>>
    %21 = vector.broadcast %20 : f32 to vector<1x8xf32>
    %22 = arith.addf %19, %21 : vector<1x8xf32>
    %c0_17 = arith.constant 0 : index
    %c0_18 = arith.constant 0 : index
    %23 = vector.load %arg8[%c0_17, %c0_18] : memref<1x8xf32, #tpu.memory_space<vmem>>, vector<1x8xf32>
    tpu.vector_store %arg8[%c0_17, %c0_18], %22 {strides = array<i32>} : memref<1x8xf32, #tpu.memory_space<vmem>>, vector<1x8xf32>,
    return
  }
  func.func @transform_0(%arg0: i32) -> (i32, i32) {
    %c0_i32 = arith.constant 0 : i32
    %c0_i32_0 = arith.constant 0 : i32
    return %c0_i32, %arg0 : i32, i32
  }
  func.func @transform_1(%arg0: i32) -> (i32, i32) {
    %c0_i32 = arith.constant 0 : i32
    %c0_i32_0 = arith.constant 0 : i32
    %c0_i32_1 = arith.constant 0 : i32
    return %c0_i32, %c0_i32_0 : i32, i32
  }
  func.func @transform_2(%arg0: i32) -> (i32, i32) {
    %c0_i32 = arith.constant 0 : i32
    %c0_i32_0 = arith.constant 0 : i32
    %c0_i32_1 = arith.constant 0 : i32
    return %c0_i32, %c0_i32_0 : i32, i32
  }
  func.func @transform_3(%arg0: i32) -> (i32, i32) {
    %c0_i32 = arith.constant 0 : i32
    %c0_i32_0 = arith.constant 0 : i32
    %c0_i32_1 = arith.constant 0 : i32
    return %c0_i32, %c0_i32_0 : i32, i32
  }
  func.func @transform_4(%arg0: i32) -> (i32, i32) {
    %c0_i32 = arith.constant 0 : i32
    %c0_i32_0 = arith.constant 0 : i32
    %c0_i32_1 = arith.constant 0 : i32
    return %c0_i32, %c0_i32_0 : i32, i32
  }
  func.func @transform_5(%arg0: i32) -> (i32, i32) {
    %c0_i32 = arith.constant 0 : i32
    %c0_i32_0 = arith.constant 0 : i32
    %c0_i32_1 = arith.constant 0 : i32
    return %c0_i32, %c0_i32_0 : i32, i32
  }
  func.func @transform_6(%arg0: i32) -> (i32, i32) {
    %c0_i32 = arith.constant 0 : i32
    %c0_i32_0 = arith.constant 0 : i32
    %c0_i32_1 = arith.constant 0 : i32
    return %c0_i32, %c0_i32_0 : i32, i32
  }
  func.func @transform_7(%arg0: i32) -> (i32, i32) {
    %c0_i32 = arith.constant 0 : i32
    %c0_i32_0 = arith.constant 0 : i32
    return %c0_i32, %arg0 : i32, i32
  }
}

</mosaic_0001>

<bundles_post_ra>
// kernel: qnetwork_forward.1
= control target key start
LH: loop header
LB: loop body
LE: loop exit
PB: predicated region body
PF: predicated region fallthrough
CT: control target
= control target key end

     0   :  { %vm191_vm0 = vcmask 1046528   ;;  %v546_v3 = vmov 0   ;;  %vm142_vm1 = vcmask 121856   ;;  %s801_s0 = inlined_call_operand.vmem [shape: f32[15,8], index: 0, kind: input, shape index: {}]   ;;  %s802_s1 = inlined_call_operand.vmem [shape: f32[128,15], index: 1, kind: input, shape index: {}]   ;;  %s803_s2 = inlined_call_operand.vmem [shape: f32[128,1], index: 2, kind: input, shape index: {}]   ;;  %s804_s3 = inlined_call_operand.vmem [shape: f32[64,128], index: 3, kind: input, shape index: {}]   ;;  %s805_s4 = inlined_call_operand.vmem [shape: f32[64,1], index: 4, kind: input, shape index: {}]   ;;  %s806_s5 = inlined_call_operand.vmem [shape: f32[64,1], index: 5, kind: input, shape index: {}]   ;;  %s807_s6 = inlined_call_operand.<no memory space> [shape: f32[1,1], index: 6, kind: input, shape index: {}]   ;;  %s808_s7 = inlined_call_operand.hbm [shape: f32[1,8], index: 7, kind: output, shape index: {}]  }
   0x1   :  { %v45_v0 = vld [vmem:[%s801_s0 + $0x8] sm:$0x7f]  ;;  %v61_v1 = vld [vmem:[%s803_s2 + $0x78] sm:$0xff]  ;;  %518 = vset.pattern.permute.xlu1 %v546_v3  ;;  %517 = vset.pattern.permute.xlu0 %v546_v3  ;;  %v44_v4 = vld [vmem:[%s801_s0] sm:$0xff] }
   0x2   :  { %v59_v2 = vld [vmem:[%s803_s2 + $0x68] sm:$0xff]  ;;  %497 = vmatpush.msk.msra.mxu2 %vm191_vm0, %v45_v0  ;;  %139 = vperm.xlu0 %517, %v61_v1   ;;  %v35_v5 = vld [vmem:[%s802_s1 + $0x38] sm:$0xff]  ;;  %v28_v6 = vld [vmem:[%s802_s1] sm:$0xff] }
   0x3   :  { %129 = vperm.xlu1 %518, %v59_v2   ;;  %480 = vmatpush.msk.msra.mxu0 %vm191_vm0, %v45_v0  ;;  %v57_v7 = vld [vmem:[%s803_s2 + $0x58] sm:$0xff]  ;;  %v60_v8 = vld [vmem:[%s803_s2 + $0x70] sm:$0xff]  ;;  %v58_v9 = vld [vmem:[%s803_s2 + $0x60] sm:$0xff] }
   0x4   :  { %498 = vmatpush.msra.mxu2 %v44_v4  ;;  %519 = vset.pattern.permute.xlu2 %v546_v3 }
   0x5   :  { %488 = vmatmul.msk.f32.vlgmr.msra.gmra.mxu2 %vm142_vm1, %v35_v5  ;;  %210 = vmatpush.msra.mxu0 %v44_v4 }
   0x6   :  { %481 = vmatmul.msk.f32.vlgmr.msra.gmra.mxu0 %vm142_vm1, %v28_v6  ;;  %119 = vperm.xlu2 %519, %v57_v7  }
   0x7   :  { %13 = vsyncpa [#allocation4], 0  ;;  %v36_v10 = vld [vmem:[%s802_s1 + $0x40] sm:$0xff]  ;;  %v29_v11 = vld [vmem:[%s802_s1 + $0x8] sm:$0xff]  ;;  %vm437_vm2 = vcmask 64512   ;;  %s471_s19 = sshll.u32 %s808_s7, 4  ;;  %s472_s19 = int_to_ptr.hbm [resolvable:$true] %s471_s19 }
   0x8   :  { %v56_v12 = vld [vmem:[%s803_s2 + $0x50] sm:$0xff]  ;;  %v55_v13 = vld [vmem:[%s803_s2 + $0x48] sm:$0xff]  ;;  %v54_v14 = vld [vmem:[%s803_s2 + $0x40] sm:$0xff]  ;;  %vm462_vm3 = vcmask 57344  }
   0x9   :  { %v37_v15 = vld [vmem:[%s802_s1 + $0x48] sm:$0xff]  ;;  %v30_v16 = vld [vmem:[%s802_s1 + $0x10] sm:$0xff]  ;;  %v53_v17 = vld [vmem:[%s803_s2 + $0x38] sm:$0xff] }
   0xa   :  { %134 = vperm.xlu0 %517, %v60_v8   ;;  %v52_v18 = vld [vmem:[%s803_s2 + $0x30] sm:$0xff]  ;;  %v51_v19 = vld [vmem:[%s803_s2 + $0x28] sm:$0xff]  ;;  %v31_v21 = vld [vmem:[%s802_s1 + $0x18] sm:$0xff] }
   0xb   :  { %124 = vperm.xlu1 %518, %v58_v9   ;;  %v38_v20 = vld [vmem:[%s802_s1 + $0x50] sm:$0xff]  ;;  %v50_v22 = vld [vmem:[%s803_s2 + $0x20] sm:$0xff]  ;;  %v49_v23 = vld [vmem:[%s803_s2 + $0x18] sm:$0xff] }
   0xc   :  { %v48_v24 = vld [vmem:[%s803_s2 + $0x10] sm:$0xff]  ;;  %v39_v25 = vld [vmem:[%s802_s1 + $0x58] sm:$0xff]  ;;  %v32_v26 = vld [vmem:[%s802_s1 + $0x20] sm:$0xff] }
   0xd   :  { %489 = vmatmul.msk.f32.gmra.mxu2 %vm142_vm1, %v36_v10  ;;  %v47_v27 = vld [vmem:[%s803_s2 + $0x8] sm:$0xff]  ;;  %v46_v28 = vld [vmem:[%s803_s2] sm:$0xff]  ;;  %v286_v33 = vld [vmem:[%s805_s4 + $0x10] sm:$0xff]  ;;  %s547_s2 = smov [#allocation3]  }
   0xe   :  { %482 = vmatmul.msk.f32.gmra.mxu0 %vm142_vm1, %v29_v11  ;;  %114 = vperm.xlu2 %519, %v56_v12   ;;  %v284_v29 = vld [vmem:[%s805_s4] sm:$0xff]  ;;  %v33_v31 = vld [vmem:[%s802_s1 + $0x28] sm:$0xff]  ;;  %v287_v34 = vld [vmem:[%s805_s4 + $0x18] sm:$0xff]  ;;  %s469_s16 = sshll.u32 %s547_s2, 4  ;;  %s470_s16 = int_to_ptr.vmem [resolvable:$true] %s469_s16 }
   0xf   :  { %v40_v30 = vld [vmem:[%s802_s1 + $0x60] sm:$0xff]  ;;  %v285_v32 = vld [vmem:[%s805_s4 + $0x8] sm:$0xff]  ;;  %v34_v36 = vld [vmem:[%s802_s1 + $0x30] sm:$0xff] }
  0x10   :  { %v41_v35 = vld [vmem:[%s802_s1 + $0x68] sm:$0xff]  ;;  %v288_v37 = vld [vmem:[%s805_s4 + $0x20] sm:$0xff]  ;;  %v42_v40 = vld [vmem:[%s802_s1 + $0x70] sm:$0xff] }
  0x11   :  { %v381_v38 = vld [vmem:[%s806_s5] sm:$0xff]  ;;  %v382_v39 = vld [vmem:[%s806_s5 + $0x8] sm:$0xff]  ;;  %v383_v41 = vld [vmem:[%s806_s5 + $0x10] sm:$0xff] }
  0x12   :  { %109 = vperm.xlu0 %517, %v55_v13   ;;  %v289_v42 = vld [vmem:[%s805_s4 + $0x28] sm:$0xff]  ;;  %v384_v43 = vld [vmem:[%s806_s5 + $0x18] sm:$0xff]  ;;  %v290_v45 = vld [vmem:[%s805_s4 + $0x30] sm:$0xff] }
  0x13   :  { %104 = vperm.xlu1 %518, %v54_v14   ;;  %v43_v44 = vld [vmem:[%s802_s1 + $0x78] sm:$0xff]  ;;  %v385_v46 = vld [vmem:[%s806_s5 + $0x20] sm:$0xff]  ;;  %v386_v48 = vld [vmem:[%s806_s5 + $0x28] sm:$0xff] }
  0x14   :  { %v291_v47 = vld [vmem:[%s805_s4 + $0x38] sm:$0xff]  ;;  %v387_v49 = vld [vmem:[%s806_s5 + $0x30] sm:$0xff] }
  0x15   :  { %490 = vmatmul.msk.f32.gmra.mxu2 %vm142_vm1, %v37_v15  ;;  %v388_v50 = vld [vmem:[%s806_s5 + $0x38] sm:$0xff] }
  0x16   :  { %483 = vmatmul.msk.f32.gmra.mxu0 %vm142_vm1, %v30_v16  ;;  %99 = vperm.xlu2 %519, %v53_v17  }
  0x1a   :  { %94 = vperm.xlu0 %517, %v52_v18  }
  0x1b   :  { %89 = vperm.xlu1 %518, %v51_v19  }
  0x1d   :  { %491 = vmatmul.msk.f32.gmra.mxu2 %vm142_vm1, %v38_v20 }
  0x1e   :  { %484 = vmatmul.msk.f32.gmra.mxu0 %vm142_vm1, %v31_v21  ;;  %84 = vperm.xlu2 %519, %v50_v22  }
  0x22   :  { %79 = vperm.xlu0 %517, %v49_v23  }
  0x23   :  { %74 = vperm.xlu1 %518, %v48_v24  }
  0x25   :  { %492 = vmatmul.msk.f32.gmra.mxu2 %vm142_vm1, %v39_v25 }
  0x26   :  { %485 = vmatmul.msk.f32.gmra.mxu0 %vm142_vm1, %v32_v26  ;;  %69 = vperm.xlu2 %519, %v47_v27  }
  0x2a   :  { %64 = vperm.xlu0 %517, %v46_v28  }
  0x2b   :  { %294 = vperm.xlu1 %518, %v284_v29  }
  0x2d   :  { %493 = vmatmul.msk.f32.gmra.mxu2 %vm142_vm1, %v40_v30 }
  0x2e   :  { %486 = vmatmul.msk.f32.gmra.mxu0 %vm142_vm1, %v33_v31  ;;  %299 = vperm.xlu2 %519, %v285_v32  }
  0x32   :  { %304 = vperm.xlu0 %517, %v286_v33  }
  0x33   :  { %309 = vperm.xlu1 %518, %v287_v34  }
  0x35   :  { %494 = vmatmul.msk.f32.gmra.mxu2 %vm142_vm1, %v41_v35 }
  0x36   :  { %487 = vmatmul.msk.f32.gmra.mxu0 %vm142_vm1, %v34_v36  ;;  %314 = vperm.xlu2 %519, %v288_v37  }
  0x3a   :  { %391 = vperm.xlu0 %517, %v381_v38  }
  0x3b   :  { %396 = vperm.xlu1 %518, %v382_v39  }
  0x3d   :  { %495 = vmatmul.msk.f32.gmra.mxu2 %vm142_vm1, %v42_v40 }
  0x3e   :  { %401 = vperm.xlu2 %519, %v383_v41  }
  0x42   :  { %319 = vperm.xlu0 %517, %v289_v42  }
  0x43   :  { %406 = vperm.xlu1 %518, %v384_v43  }
  0x45   :  { %496 = vmatmul.msk.f32.gmra.mxu2 %vm142_vm1, %v43_v44 }
  0x46   :  { %324 = vperm.xlu2 %519, %v290_v45  }
  0x4a   :  { %411 = vperm.xlu0 %517, %v385_v46  }
  0x4b   :  { %329 = vperm.xlu1 %518, %v291_v47  }
  0x4e   :  { %416 = vperm.xlu2 %519, %v386_v48  }
  0x52   :  { %421 = vperm.xlu0 %517, %v387_v49  }
  0x53   :  { %426 = vperm.xlu1 %518, %v388_v50  }
  0x60   :  { %v120_v0 = vpop.permute.xlu2 %119 }
  0x68   :  { %v115_v5 = vpop.permute.xlu2 %114 }
  0x70   :  { %v100_v18 = vpop.permute.xlu2 %99 }
  0x74   :  { %v140_v60 = vpop.permute.xlu0 %139 }
  0x75   :  { %v130_v61 = vpop.permute.xlu1 %129 }
  0x78   :  { %v85_v30 = vpop.permute.xlu2 %84 }
  0x7c   :  { %v135_v1 = vpop.permute.xlu0 %134 }
  0x7d   :  { %v125_v3 = vpop.permute.xlu1 %124 }
  0x80   :  { %v70_v43 = vpop.permute.xlu2 %69 }
  0x83   :  { %v754_v54 = vpop.f32.mrf.mxu0 }
  0x84   :  { %v110_v6 = vpop.permute.xlu0 %109 }
  0x85   :  { %v105_v12 = vpop.permute.xlu1 %104 }
  0x88   :  { %v233_v51 = vpop.f32.mrf.mxu2 }
  0x89   :  { %v234_v28 = vadd.f32 %v233_v51, %v100_v18  ;;  %v276_v51 = vld [vmem:[%s804_s3] sm:$0xff] }
  0x8b   :  { %v756_v56 = vpop.f32.mrf.mxu0  ;;  %v267_v34 = vmax.f32 %v234_v28, 0.0 }
  0x8c   :  { %v95_v19 = vpop.permute.xlu0 %94  ;;  %v216_v44 = vadd.f32 %v756_v56, %v70_v43  ;;  %v283_v56 = vld [vmem:[%s804_s3 + $0x38] sm:$0xff] }
  0x8d   :  { %v90_v26 = vpop.permute.xlu1 %89 }
  0x8e   :  { %v261_v49 = vmax.f32 %v216_v44, 0.0 }
  0x90   :  { %v236_v52 = vpop.f32.mrf.mxu2 }
  0x91   :  { %v237_v24 = vadd.f32 %v236_v52, %v105_v12  ;;  %v281_v52 = vld [vmem:[%s804_s3 + $0x28] sm:$0xff] }
  0x93   :  { %v758_v58 = vpop.f32.mrf.mxu0  ;;  %v268_v31 = vmax.f32 %v237_v24, 0.0 }
  0x94   :  { %v80_v33 = vpop.permute.xlu0 %79 }
  0x95   :  { %v75_v40 = vpop.permute.xlu1 %74 }
  0x96   :  { %v219_v41 = vadd.f32 %v758_v58, %v75_v40  ;;  %v280_v58 = vld [vmem:[%s804_s3 + $0x20] sm:$0xff] }
  0x98   :  { %v239_v53 = vpop.f32.mrf.mxu2  ;;  %v262_v48 = vmax.f32 %v219_v41, 0.0 }
  0x99   :  { %v240_v22 = vadd.f32 %v239_v53, %v110_v6  ;;  %v277_v53 = vld [vmem:[%s804_s3 + $0x8] sm:$0xff] }
  0x9b   :  { %v221_v62 = vpop.f32.mrf.mxu0  ;;  %v269_v29 = vmax.f32 %v240_v22, 0.0 }
  0x9c   :  { %v222_v38 = vadd.f32 %v221_v62, %v80_v33  ;;  %v65_v46 = vpop.permute.xlu0 %64 }
  0x9d   :  { %v213_v47 = vadd.f32 %v754_v54, %v65_v46  ;;  %v282_v54 = vld [vmem:[%s804_s3 + $0x30] sm:$0xff] }
  0x9e   :  { %v263_v45 = vmax.f32 %v222_v38, 0.0 }
  0x9f   :  { %v260_v50 = vmax.f32 %v213_v47, 0.0 }
  0xa0   :  { %v242_v55 = vpop.f32.mrf.mxu2 }
  0xa1   :  { %v243_v20 = vadd.f32 %v242_v55, %v115_v5  ;;  %v278_v55 = vld [vmem:[%s804_s3 + $0x10] sm:$0xff] }
  0xa3   :  { %v224_v4 = vpop.f32.mrf.mxu0  ;;  %v270_v25 = vmax.f32 %v243_v20, 0.0 }
  0xa4   :  { %v225_v36 = vadd.f32 %v224_v4, %v85_v30 }
  0xa6   :  { %v264_v42 = vmax.f32 %v225_v36, 0.0 }
  0xa8   :  { %v245_v57 = vpop.f32.mrf.mxu2 }
  0xa9   :  { %v246_v16 = vadd.f32 %v245_v57, %v120_v0  ;;  %v279_v57 = vld [vmem:[%s804_s3 + $0x18] sm:$0xff] }
  0xab   :  { %v227_v13 = vpop.f32.mrf.mxu0  ;;  %v271_v23 = vmax.f32 %v246_v16, 0.0 }
  0xac   :  { %v228_v35 = vadd.f32 %v227_v13, %v90_v26 }
  0xae   :  { %v265_v39 = vmax.f32 %v228_v35, 0.0 }
  0xb0   :  { %v248_v59 = vpop.f32.mrf.mxu2 }
  0xb1   :  { %v249_v14 = vadd.f32 %v248_v59, %v125_v3  ;;  %v295_v59 = vpop.permute.xlu1 %294 }
  0xb3   :  { %v272_v21 = vmax.f32 %v249_v14, 0.0  ;;  %v230_v27 = vpop.f32.mrf.mxu0 }
  0xb4   :  { %v231_v32 = vadd.f32 %v230_v27, %v95_v19 }
  0xb6   :  { %v266_v37 = vmax.f32 %v231_v32, 0.0 }
  0xb8   :  { %v251_v63 = vpop.f32.mrf.mxu2 }
  0xb9   :  { %v252_v10 = vadd.f32 %v251_v63, %v130_v61  ;;  %v305_v61 = vpop.permute.xlu0 %304  ;;  %v310_v62 = vpop.permute.xlu1 %309 }
  0xbb   :  { %v273_v17 = vmax.f32 %v252_v10, 0.0 }
  0xc0   :  { %v254_v2 = vpop.f32.mrf.mxu2 }
  0xc1   :  { %v255_v8 = vadd.f32 %v254_v2, %v135_v1  ;;  %v392_v1 = vpop.permute.xlu0 %391  ;;  %v397_v3 = vpop.permute.xlu1 %396 }
  0xc3   :  { %v274_v15 = vmax.f32 %v255_v8, 0.0 }
  0xc8   :  { %v257_v7 = vpop.f32.mrf.mxu2 }
  0xc9   :  { %v258_v9 = vadd.f32 %v257_v7, %v140_v60  ;;  %v300_v60 = vpop.permute.xlu2 %299  ;;  %v320_v7 = vpop.permute.xlu0 %319 }
  0xcb   :  { %v275_v11 = vmax.f32 %v258_v9, 0.0  ;;  %v407_v9 = vpop.permute.xlu1 %406 }
  0xcd   :  { %332 = vmatpush.msra.mxu1 %v275_v11  ;;  %499 = vmatpush.msra.mxu3 %v275_v11 }
  0xcf   :  { %333 = vmatpush.msra.mxu1 %v274_v15  ;;  %500 = vmatpush.msra.mxu3 %v274_v15 }
  0xd1   :  { %334 = vmatpush.msra.mxu1 %v273_v17  ;;  %501 = vmatpush.msra.mxu3 %v273_v17  ;;  %v315_v0 = vpop.permute.xlu2 %314 }
  0xd3   :  { %335 = vmatpush.msra.mxu1 %v272_v21  ;;  %502 = vmatpush.msra.mxu3 %v272_v21  ;;  %v412_v21 = vpop.permute.xlu0 %411 }
  0xd5   :  { %336 = vmatpush.msra.mxu1 %v271_v23  ;;  %503 = vmatpush.msra.mxu3 %v271_v23 }
  0xd7   :  { %337 = vmatpush.msra.mxu1 %v270_v25  ;;  %504 = vmatpush.msra.mxu3 %v270_v25  ;;  %v330_v25 = vpop.permute.xlu1 %329 }
  0xd9   :  { %338 = vmatpush.msra.mxu1 %v269_v29  ;;  %505 = vmatpush.msra.mxu3 %v269_v29  ;;  %v402_v5 = vpop.permute.xlu2 %401 }
  0xdb   :  { %339 = vmatpush.msra.mxu1 %v268_v31  ;;  %506 = vmatpush.msra.mxu3 %v268_v31 }
  0xdd   :  { %340 = vmatpush.msra.mxu1 %v267_v34  ;;  %507 = vmatpush.msra.mxu3 %v267_v34 }
  0xdf   :  { %341 = vmatpush.msra.mxu1 %v266_v37  ;;  %508 = vmatpush.msra.mxu3 %v266_v37 }
  0xe1   :  { %342 = vmatpush.msra.mxu1 %v265_v39  ;;  %509 = vmatpush.msra.mxu3 %v265_v39  ;;  %v325_v18 = vpop.permute.xlu2 %324 }
  0xe3   :  { %343 = vmatpush.msra.mxu1 %v264_v42  ;;  %510 = vmatpush.msra.mxu3 %v264_v42 }
  0xe5   :  { %344 = vmatpush.msra.mxu1 %v263_v45  ;;  %511 = vmatpush.msra.mxu3 %v263_v45  ;;  %v422_v45 = vpop.permute.xlu0 %421 }
  0xe7   :  { %345 = vmatpush.msra.mxu1 %v262_v48  ;;  %512 = vmatpush.msra.mxu3 %v262_v48 }
  0xe9   :  { %346 = vmatpush.msra.mxu1 %v261_v49  ;;  %513 = vmatpush.msra.mxu3 %v261_v49  ;;  %v417_v40 = vpop.permute.xlu2 %416  ;;  %v427_v49 = vpop.permute.xlu1 %426 }
  0xeb   :  { %347 = vmatpush.msra.mxu1 %v260_v50  ;;  %514 = vmatpush.msra.mxu3 %v260_v50 }
  0xec   :  { %348 = vmatmul.f32.vlgmr.msra.gmra.mxu1 %v276_v51  ;;  %363 = vmatmul.f32.vlgmr.msra.gmra.mxu3 %v281_v52 }
  0xf4   :  { %351 = vmatmul.f32.gmra.mxu1 %v277_v53  ;;  %366 = vmatmul.f32.gmra.mxu3 %v282_v54 }
  0xfc   :  { %354 = vmatmul.f32.gmra.mxu1 %v278_v55  ;;  %369 = vmatmul.f32.gmra.mxu3 %v283_v56 }
 0x104   :  { %357 = vmatmul.f32.gmra.mxu1 %v279_v57 }
 0x10c   :  { %360 = vmatmul.f32.gmra.mxu1 %v280_v58 }
 0x169   :  { %v349_v63 = vpop.f32.mrf.mxu1 }
 0x16a   :  { %v350_v10 = vadd.f32 %v349_v63, %v295_v59  ;;  %v460_v63 = vstv %s807_s6 }
 0x16c   :  { %v373_v14 = vmax.f32 %v350_v10, 0.0 }
 0x16e   :  { %v429_v22 = vmul.f32 %v392_v1, %v373_v14 }
 0x16f   :  { %v364_v4 = vpop.f32.mrf.mxu3 }
 0x170   :  { %v365_v23 = vadd.f32 %v364_v4, %v320_v7  ;;  %v438_v30 = vsel %vm437_vm2, %v429_v22, 0.0 }
 0x171   :  { %v352_v2 = vpop.f32.mrf.mxu1 }
 0x172   :  { %v353_v8 = vadd.f32 %v352_v2, %v300_v60  ;;  %v378_v32 = vmax.f32 %v365_v23, 0.0 }
 0x174   :  { %v374_v13 = vmax.f32 %v353_v8, 0.0  ;;  %v434_v42 = vmul.f32 %v417_v40, %v378_v32 }
 0x176   :  { %v430_v19 = vmul.f32 %v397_v3, %v374_v13  ;;  %v447_v51 = vsel %vm437_vm2, %v434_v42, 0.0 }
 0x177   :  { %v367_v11 = vpop.f32.mrf.mxu3 }
 0x178   :  { %v439_v27 = vsel %vm437_vm2, %v430_v19, 0.0  ;;  %v368_v28 = vadd.f32 %v367_v11, %v325_v18 }
 0x179   :  { %v355_v6 = vpop.f32.mrf.mxu1  ;;  %v440_v36 = vadd.f32 %v439_v27, %v438_v30 }
 0x17a   :  { %v356_v12 = vadd.f32 %v355_v6, %v305_v61  ;;  %v379_v37 = vmax.f32 %v368_v28, 0.0 }
 0x17c   :  { %v375_v16 = vmax.f32 %v356_v12, 0.0  ;;  %v435_v47 = vmul.f32 %v422_v45, %v379_v37 }
 0x17e   :  { %v431_v24 = vmul.f32 %v402_v5, %v375_v16  ;;  %v449_v54 = vsel %vm437_vm2, %v435_v47, 0.0 }
 0x17f   :  { %v370_v26 = vpop.f32.mrf.mxu3 }
 0x180   :  { %v441_v33 = vsel %vm437_vm2, %v431_v24, 0.0  ;;  %v371_v34 = vadd.f32 %v370_v26, %v330_v25 }
 0x181   :  { %v358_v15 = vpop.f32.mrf.mxu1  ;;  %v442_v41 = vadd.f32 %v441_v33, %v440_v36 }
 0x182   :  { %v359_v17 = vadd.f32 %v358_v15, %v310_v62  ;;  %v380_v43 = vmax.f32 %v371_v34, 0.0 }
 0x184   :  { %v376_v20 = vmax.f32 %v359_v17, 0.0  ;;  %v436_v52 = vmul.f32 %v427_v49, %v380_v43 }
 0x186   :  { %v432_v29 = vmul.f32 %v407_v9, %v376_v20  ;;  %v451_v56 = vsel %vm437_vm2, %v436_v52, 0.0 }
 0x188   :  { %v443_v38 = vsel %vm437_vm2, %v432_v29, 0.0 }
 0x189   :  { %v361_v31 = vpop.f32.mrf.mxu1  ;;  %v444_v46 = vadd.f32 %v443_v38, %v442_v41 }
 0x18a   :  { %v362_v35 = vadd.f32 %v361_v31, %v315_v0 }
 0x18c   :  { %v377_v39 = vmax.f32 %v362_v35, 0.0 }
 0x18e   :  { %v433_v44 = vmul.f32 %v412_v21, %v377_v39 }
 0x190   :  { %v445_v48 = vsel %vm437_vm2, %v433_v44, 0.0 }
 0x191   :  { %v446_v50 = vadd.f32 %v445_v48, %v444_v46 }
 0x193   :  { %v448_v53 = vadd.f32 %v447_v51, %v446_v50 }
 0x195   :  { %v450_v55 = vadd.f32 %v449_v54, %v448_v53 }
 0x197   :  { %v452_v57 = vadd.f32 %v451_v56, %v450_v55 }
 0x199   :  { %v453_v58 = vrot.slane %v452_v57, 4 }
 0x19b   :  { %v454_v59 = vadd.f32 %v453_v58, %v452_v57 }
 0x19d   :  { %v455_v60 = vrot.slane %v454_v59, 2 }
 0x19f   :  { %v456_v61 = vadd.f32 %v455_v60, %v454_v59 }
 0x1a1   :  { %v457_v62 = vrot.slane %v456_v61, 1 }
 0x1a3   :  { %v458_v0 = vadd.f32 %v457_v62, %v456_v61 }
 0x1a5   :  { %v461_v1 = vadd.f32 %v460_v63, %v458_v0 }
 0x1a7   :  { %463 = vst.msk [vmem:[#allocation3] sm:$0x1] %vm462_vm3, %v461_v1 }
 0x1a8   :  { %474 = dma.vmem_to_hbm [thread:$0]  %s470_s16, 16, %s472_s19, [#allocation4]  }
 0x1a9   :  { %544 = dma.done.wait [#allocation4], 16  }
 0x1aa   :  { %545 = vsyncadd [#allocation4], 4294967280 }
 0x1ab   :  { %479 = vsyncpa [#allocation4], 1 }

</bundles_post_ra>
